<compile_context>
chip_gen: v5e
topology: v5e:2x2
jax: 0.10.0
libtpu: 0.0.40
codegen_flags: <defaults>
</compile_context>

<pallas_src>
import functools

import jax
import jax.numpy as jnp
from jax.experimental import pallas as pl
from jax.experimental.pallas import tpu as pltpu


def embedding_kernel(src_ref,        # SMEM (B*S,) int32   -- scalar prefetch (pre-clamped ids)
                     seg_ref,        # VMEM (T, 1) int32
                     pos_ref,        # VMEM (T, D) f32     (rows of the pos table for tile j)
                     segtbl_ref,     # VMEM (NSEG, D) f32
                     gamma_ref,      # VMEM (1, D) f32
                     beta_ref,       # VMEM (1, D) f32
                     word_src,       # HBM (ANY) or VMEM-resident (V, D) f32 word table
                     out_ref,        # VMEM (T, D) out_dtype
                     word_buf,       # VMEM scratch (2 or 1, T, D) f32
                     *maybe_sems,    # DMA semaphores (2,)  -- only for the HBM-gather path
                     eps, tile_rows, seq_len, nseg, gather_by_dma):
    b = pl.program_id(0)
    j = pl.program_id(1)
    num_j = pl.num_programs(1)

    if gather_by_dma:
        # ---- word rows: double-buffered HBM row-gather (one DMA per token) ----
        sems = maybe_sems[0]
        slot = j % 2

        def issue_row_gathers(tile_j, dst_slot):
            base = b * seq_len + tile_j * tile_rows

            @pl.loop(0, tile_rows)
            def _(t):
                wid = src_ref[base + t]                    # pre-clamped in wrapper
                pltpu.make_async_copy(
                    word_src.at[pl.ds(wid, 1), :],
                    word_buf.at[dst_slot, pl.ds(t, 1), :],
                    sems.at[dst_slot],
                ).start()

        # Prologue: first tile of this sequence gathers into its own slot.
        @pl.when(j == 0)
        def _():
            issue_row_gathers(0, 0)

        # Prefetch the next tile of the same sequence into the other slot.
        @pl.when(j + 1 < num_j)
        def _():
            issue_row_gathers(j + 1, 1 - slot)
    else:
        # ---- word rows: VMEM-resident table, plain dynamic vector loads ----
        slot = 0
        base = b * seq_len + j * tile_rows

        @pl.loop(0, tile_rows)
        def _(t):
            wid = src_ref[base + t]
            word_buf[0, pl.ds(t, 1), :] = word_src[pl.ds(wid, 1), :]

    # ---- position + segment embeddings (independent of gathered rows) ----
    # Done BEFORE the DMA waits so this VPU work overlaps in-flight gathers.
    seg_ids = seg_ref[...]                                 # (T, 1) int32
    segtbl = segtbl_ref[...]                               # (NSEG, D)
    rest = pos_ref[...]                                    # (T, D) f32
    for s in range(nseg):                                  # NSEG tiny -> VPU selects
        rest = rest + jnp.where(seg_ids == s, segtbl[s:s + 1, :], 0.0)
    gamma = gamma_ref[...]                                 # (1, D)
    beta = beta_ref[...]                                   # (1, D)

    if gather_by_dma:
        # Wait for this tile's gathers: one equal-size wait per row on the
        # shared per-slot semaphore (total decrements == total increments).
        @pl.loop(0, tile_rows)
        def _(t):
            pltpu.make_async_copy(
                word_src.at[pl.ds(0, 1), :],
                word_buf.at[slot, pl.ds(t, 1), :],
                sems.at[slot],
            ).wait()

    emb = word_buf[slot].astype(jnp.float32) + rest        # (T, D) f32
    d = emb.shape[-1]

    # ---- LayerNorm: unbiased std, eps OUTSIDE sqrt (TencentPretrain LN) ----
    mean = jnp.mean(emb, axis=-1, keepdims=True)
    centered = emb - mean
    var = jnp.sum(centered * centered, axis=-1, keepdims=True) / (d - 1)
    inv_std = pl.reciprocal(jnp.sqrt(var) + eps)           # exact reciprocal
    out_ref[...] = (centered * (gamma * inv_std) + beta).astype(out_ref.dtype)
    # Dropout is identity in eval mode.


def embedding_forward(src, seg, word_tbl, pos_tbl, seg_tbl, gamma, beta,
                      eps=1e-6, *, tile_rows=None, words_in_vmem=None,
                      out_dtype=jnp.float32):
    B, S = src.shape
    V, D = word_tbl.shape
    MAXPOS = pos_tbl.shape[0]
    NSEG = seg_tbl.shape[0]

    assert S <= MAXPOS, "sequence longer than positional table"
    assert D % 128 == 0, "hidden size must be lane-aligned (multiple of 128)"

    out_dtype = jnp.dtype(out_dtype)
    word_dtype = jnp.dtype(jnp.float32)        # TODO(synk): u32-packed bf16 rows
    sub32 = out_dtype.itemsize < 4

    # Row tile: multiple of 8 (16 if any sub-32-bit tile), divides S, <= 512.
    if tile_rows is None:
        for cand in (512, 256, 128, 64, 32, 16, 8):
            if S % cand == 0 and (cand % 16 == 0 or not sub32):
                tile_rows = cand
                break
        else:
            raise ValueError("S has no supported row-tile divisor")
    assert S % tile_rows == 0
    assert tile_rows % (16 if sub32 else 8) == 0
    num_j = S // tile_rows

    word_isz = word_dtype.itemsize
    out_isz = out_dtype.itemsize
    if words_in_vmem is None:
        # Conservative so 2x table + working buffers stay well inside 64 MiB (v7x).
        words_in_vmem = V * D * word_isz <= (12 << 20)
    gather_by_dma = not words_in_vmem

    # Hoisted id clamp (one fused XLA op; keeps DMA/vector gathers in-bounds).
    src_flat = jnp.clip(src.reshape(B * S), 0, V - 1).astype(jnp.int32)
    seg2d = seg.reshape(B * S, 1).astype(jnp.int32)
    pos_s = pos_tbl[:S].astype(jnp.float32)
    seg_tbl_f = seg_tbl.astype(jnp.float32)
    gamma2d = gamma.reshape(1, D).astype(jnp.float32)
    beta2d = beta.reshape(1, D).astype(jnp.float32)
    word_tbl_c = word_tbl.astype(word_dtype)

    if words_in_vmem:
        word_spec = pl.BlockSpec((V, D), lambda b, j, ids: (0, 0))   # resident
    else:
        word_spec = pl.BlockSpec(memory_space=pl.ANY)                # raw HBM ref

    n_word_bufs = 2 if gather_by_dma else 1
    scratch = [pltpu.VMEM((n_word_bufs, tile_rows, D), word_dtype)]
    if gather_by_dma:
        scratch.append(pltpu.SemaphoreType.DMA((2,)))

    grid_spec = pltpu.PrefetchScalarGridSpec(
        num_scalar_prefetch=1,                 # token ids -> SMEM
        grid=(B, num_j),                       # batch x row-tiles
        in_specs=[
            pl.BlockSpec((tile_rows, 1), lambda b, j, ids: (b * num_j + j, 0)),
            pl.BlockSpec((tile_rows, D), lambda b, j, ids: (j, 0)),
            pl.BlockSpec((NSEG, D), lambda b, j, ids: (0, 0)),
            pl.BlockSpec((1, D), lambda b, j, ids: (0, 0)),
            pl.BlockSpec((1, D), lambda b, j, ids: (0, 0)),
            word_spec,
        ],
        out_specs=pl.BlockSpec((tile_rows, D), lambda b, j, ids: (b * num_j + j, 0)),
        scratch_shapes=scratch,
    )

    # VMEM budget from actual buffer sizes (double-buffered pipeline blocks).
    vmem_bytes = (2 * tile_rows * D * out_isz          # out blocks
                  + 2 * tile_rows * D * 4              # pos blocks
                  + 2 * tile_rows * 4                  # seg-id blocks
                  + 2 * (NSEG + 2) * D * 4             # seg table + gamma + beta
                  + n_word_bufs * tile_rows * D * word_isz)
    if words_in_vmem:
        vmem_bytes += 2 * V * D * word_isz
    vmem_limit = int(min(max(1.5 * vmem_bytes + (2 << 20), 16 << 20), 64 << 20))

    tokens = B * S
    word_traffic = tokens * D * word_isz if gather_by_dma else V * D * word_isz
    cost = pl.CostEstimate(
        flops=10 * tokens * D,
        transcendentals=tokens,
        bytes_accessed=int(word_traffic + tokens * D * (out_isz + 4)
                           + tokens * 8 + (NSEG + 2) * D * 4),
    )

    out_flat = pl.pallas_call(
        functools.partial(embedding_kernel, eps=eps, tile_rows=tile_rows,
                          seq_len=S, nseg=NSEG, gather_by_dma=gather_by_dma),
        out_shape=jax.ShapeDtypeStruct((B * S, D), out_dtype),
        grid_spec=grid_spec,
        compiler_params=pltpu.CompilerParams(
            # DMA path prefetches along j -> j must stay sequential ("arbitrary").
            dimension_semantics=("parallel",
                                 "arbitrary" if gather_by_dma else "parallel"),
            vmem_limit_bytes=vmem_limit,
        ),
        cost_estimate=cost,
    )(src_flat, seg2d, pos_s, seg_tbl_f, gamma2d, beta2d, word_tbl_c)

    return out_flat.reshape(B, S, D)           # wrapper-side reshape (free)


def embedding_reference(src, seg, word_tbl, pos_tbl, seg_tbl, gamma, beta,
                        eps=1e-6):
    B, S = src.shape
    D = word_tbl.shape[1]
    emb = (word_tbl[src]
           + pos_tbl[jnp.arange(S)][None, :, :]
           + seg_tbl[seg])
    mean = emb.mean(-1, keepdims=True)
    centered = emb - mean
    var = jnp.sum(centered * centered, -1, keepdims=True) / (D - 1)
    std = jnp.sqrt(var) + eps
    return gamma * centered / std + beta


if __name__ == "__main__":
    B, S, D = 2, 32, 128
    V, NSEG, MAXPOS = 64, 3, 64
    EPS = 1e-6

    key = jax.random.PRNGKey(0)
    k1, k2, k3, k4, k5 = jax.random.split(key, 5)

    word_tbl = 0.02 * jax.random.normal(k1, (V, D), jnp.float32)
    pos_tbl = 0.02 * jax.random.normal(k2, (MAXPOS, D), jnp.float32)
    seg_tbl = 0.02 * jax.random.normal(k3, (NSEG, D), jnp.float32)
    gamma = jnp.ones((D,), jnp.float32)    # LayerNorm.gamma
    beta = jnp.zeros((D,), jnp.float32)    # LayerNorm.beta

    src = jax.random.randint(k4, (B, S), 0, V, dtype=jnp.int32)
    seg = jax.random.randint(k5, (B, S), 0, NSEG, dtype=jnp.int32)

    ref = embedding_reference(src, seg, word_tbl, pos_tbl, seg_tbl, gamma,
                              beta, eps=EPS)

    # Path 1: HBM row-gather (double-buffered DMAs), f32 output -> strict parity.
    out_f32 = embedding_forward(src, seg, word_tbl, pos_tbl, seg_tbl, gamma,
                                beta, eps=EPS, tile_rows=16,
                                words_in_vmem=False, out_dtype=jnp.float32)
    jax.block_until_ready(out_f32)
    assert out_f32.shape == (B, S, D)
    assert jnp.allclose(out_f32, ref, atol=1e-4, rtol=1e-4), \
        "HBM-gather path mismatch vs reference"

    # Path 2: VMEM-resident word table (vector-load gather), bf16 output.
    out_bf16 = embedding_forward(src, seg, word_tbl, pos_tbl, seg_tbl, gamma,
                                 beta, eps=EPS, tile_rows=16,
                                 words_in_vmem=True, out_dtype=jnp.bfloat16)
    jax.block_until_ready(out_bf16)
    assert out_bf16.shape == (B, S, D) and out_bf16.dtype == jnp.bfloat16
    assert jnp.allclose(out_bf16.astype(jnp.float32), ref,
                        atol=1e-2, rtol=2e-2), \
        "VMEM-resident path mismatch vs reference (bf16 output tolerance)"

    print("KERNEL_OK")
</pallas_src>

<mosaic_0001>
module attributes {stable_mosaic.version = 11 : i64} {
  func.func @embedding_kernel(%arg0: i32, %arg1: i32, %arg2: memref<64xi32, #tpu.memory_space<smem>>, %arg3: memref<16x1xi32, #tpu.memory_space<vmem>>, %arg4: memref<16x128xf32, #tpu.memory_space<vmem>>, %arg5: memref<3x128xf32, #tpu.memory_space<vmem>>, %arg6: memref<1x128xf32, #tpu.memory_space<vmem>>, %arg7: memref<1x128xf32, #tpu.memory_space<vmem>>, %arg8: memref<64x128xf32, #tpu.memory_space<any>>, %arg9: memref<16x128xf32, #tpu.memory_space<vmem>>, %arg10: memref<2x16x128xf32, #tpu.memory_space<vmem>>, %arg11: memref<2x!tpu.dma_semaphore, #tpu.memory_space<semaphore_mem>>) attributes {dimension_semantics = [#tpu.dimension_semantics<parallel>, #tpu.dimension_semantics<arbitrary>], iteration_bounds = array<i64: 2, 2>, scalar_prefetch = 1 : i64, scratch_operands = 2 : i64, tpu.core_type = #tpu.core_type<tc>, window_params = [{transform_indices = @transform_0, window_bounds = array<i64: 16, 1>}, {transform_indices = @transform_1, window_bounds = array<i64: 16, 128>}, {pipeline_mode = #tpu.pipeline_mode<synchronous>, transform_indices = @transform_2, window_bounds = array<i64: 3, 128>}, {pipeline_mode = #tpu.pipeline_mode<synchronous>, transform_indices = @transform_3, window_bounds = array<i64: 1, 128>}, {pipeline_mode = #tpu.pipeline_mode<synchronous>, transform_indices = @transform_4, window_bounds = array<i64: 1, 128>}, {}, {transform_indices = @transform_6, window_bounds = array<i64: 16, 128>}]} {
    %c2_i32 = arith.constant 2 : i32
    %c0_i32 = arith.constant 0 : i32
    %0 = arith.cmpi eq, %c2_i32, %c0_i32 : i32
    %c1_i32 = arith.constant 1 : i32
    %1 = arith.select %0, %c1_i32, %c2_i32 : i32
    %2 = arith.remsi %arg1, %1 : i32
    %c0_i32_0 = arith.constant 0 : i32
    %3 = arith.cmpi ne, %2, %c0_i32_0 : i32
    %c0_i32_1 = arith.constant 0 : i32
    %4 = arith.cmpi slt, %2, %c0_i32_1 : i32
    %c0_i32_2 = arith.constant 0 : i32
    %5 = arith.cmpi slt, %1, %c0_i32_2 : i32
    %6 = arith.xori %4, %5 : i1
    %7 = arith.andi %6, %3 : i1
    %8 = arith.addi %2, %1 : i32
    %9 = arith.select %7, %8, %2 : i32
    %c0_i32_3 = arith.constant 0 : i32
    %10 = arith.cmpi eq, %arg1, %c0_i32_3 : i32
    %11 = arith.extui %10 : i1 to i32
    %c0_i32_4 = arith.constant 0 : i32
    %12 = arith.cmpi ne, %11, %c0_i32_4 : i32
    scf.if %12 {
      %c32_i32 = arith.constant 32 : i32
      %79 = arith.muli %arg0, %c32_i32 : i32
      %c0_i32_34 = arith.constant 0 : i32
      %80 = arith.addi %79, %c0_i32_34 : i32
      %c0_i32_35 = arith.constant 0 : i32
      %c16_i32_36 = arith.constant 16 : i32
      %81 = arith.addi %c0_i32_35, %c16_i32_36 : i32
      %c1_i32_37 = arith.constant 1 : i32
      scf.for %arg12 = %c0_i32_35 to %81 step %c1_i32_37  : i32 {
        %c1_i32_39 = arith.constant 1 : i32
        %82 = arith.muli %arg12, %c1_i32_39 : i32
        %c0_i32_40 = arith.constant 0 : i32
        %83 = arith.addi %c0_i32_40, %82 : i32
        %84 = arith.addi %80, %83 : i32
        %85 = arith.index_cast %84 : i32 to index
        %86 = memref.load %arg2[%85] : memref<64xi32, #tpu.memory_space<smem>>
        %c0_i32_41 = arith.constant 0 : i32
        %c0_i32_42 = arith.constant 0 : i32
        %c0_i32_43 = arith.constant 0 : i32
        %87 = tpu.memref_slice %arg8[%86, %c0_i32_43] : memref<64x128xf32, #tpu.memory_space<any>> -> memref<1x128xf32, #tpu.memory_space<any>>
        %c0_i32_44 = arith.constant 0 : i32
        %88 = tpu.memref_slice %arg10[%c0_i32_41, %83, %c0_i32_44] : memref<2x16x128xf32, #tpu.memory_space<vmem>> -> memref<1x1x128xf32, #tpu.memory_space<vmem>>
        %89 = tpu.memref_squeeze %88 : memref<1x1x128xf32, #tpu.memory_space<vmem>> -> memref<1x128xf32, #tpu.memory_space<vmem>>
        %90 = tpu.memref_slice %arg11[%c0_i32_42] : memref<2x!tpu.dma_semaphore, #tpu.memory_space<semaphore_mem>> -> memref<1x!tpu.dma_semaphore, #tpu.memory_space<semaphore_mem>>
        %91 = tpu.memref_squeeze %90 : memref<1x!tpu.dma_semaphore, #tpu.memory_space<semaphore_mem>> -> memref<!tpu.dma_semaphore, #tpu.memory_space<semaphore_mem>>
        tpu.enqueue_dma source(%87 : memref<1x128xf32, #tpu.memory_space<any>>) target(%89 : memref<1x128xf32, #tpu.memory_space<vmem>>) target_semaphore(%91 : memref<!tpu.dma_semaphore, #tpu.memory_space<semaphore_mem>>)
      }
      %c16_i32_38 = arith.constant 16 : i32
    } else {
    }
    %c1_i32_5 = arith.constant 1 : i32
    %13 = arith.addi %arg1, %c1_i32_5 : i32
    %c2_i32_6 = arith.constant 2 : i32
    %14 = arith.cmpi slt, %13, %c2_i32_6 : i32
    %15 = arith.extui %14 : i1 to i32
    %c0_i32_7 = arith.constant 0 : i32
    %16 = arith.cmpi ne, %15, %c0_i32_7 : i32
    scf.if %16 {
      %c1_i32_34 = arith.constant 1 : i32
      %79 = arith.addi %arg1, %c1_i32_34 : i32
      %c1_i32_35 = arith.constant 1 : i32
      %80 = arith.subi %c1_i32_35, %9 : i32
      %c32_i32 = arith.constant 32 : i32
      %81 = arith.muli %arg0, %c32_i32 : i32
      %c16_i32_36 = arith.constant 16 : i32
      %82 = arith.muli %79, %c16_i32_36 : i32
      %83 = arith.addi %81, %82 : i32
      %c0_i32_37 = arith.constant 0 : i32
      %c16_i32_38 = arith.constant 16 : i32
      %84 = arith.addi %c0_i32_37, %c16_i32_38 : i32
      %c1_i32_39 = arith.constant 1 : i32
      scf.for %arg12 = %c0_i32_37 to %84 step %c1_i32_39  : i32 {
        %c1_i32_41 = arith.constant 1 : i32
        %85 = arith.muli %arg12, %c1_i32_41 : i32
        %c0_i32_42 = arith.constant 0 : i32
        %86 = arith.addi %c0_i32_42, %85 : i32
        %87 = arith.addi %83, %86 : i32
        %88 = arith.index_cast %87 : i32 to index
        %89 = memref.load %arg2[%88] : memref<64xi32, #tpu.memory_space<smem>>
        %c0_i32_43 = arith.constant 0 : i32
        %90 = tpu.memref_slice %arg8[%89, %c0_i32_43] : memref<64x128xf32, #tpu.memory_space<any>> -> memref<1x128xf32, #tpu.memory_space<any>>
        %c0_i32_44 = arith.constant 0 : i32
        %91 = tpu.memref_slice %arg10[%80, %86, %c0_i32_44] : memref<2x16x128xf32, #tpu.memory_space<vmem>> -> memref<1x1x128xf32, #tpu.memory_space<vmem>>
        %92 = tpu.memref_squeeze %91 : memref<1x1x128xf32, #tpu.memory_space<vmem>> -> memref<1x128xf32, #tpu.memory_space<vmem>>
        %93 = tpu.memref_slice %arg11[%80] : memref<2x!tpu.dma_semaphore, #tpu.memory_space<semaphore_mem>> -> memref<1x!tpu.dma_semaphore, #tpu.memory_space<semaphore_mem>>
        %94 = tpu.memref_squeeze %93 : memref<1x!tpu.dma_semaphore, #tpu.memory_space<semaphore_mem>> -> memref<!tpu.dma_semaphore, #tpu.memory_space<semaphore_mem>>
        tpu.enqueue_dma source(%90 : memref<1x128xf32, #tpu.memory_space<any>>) target(%92 : memref<1x128xf32, #tpu.memory_space<vmem>>) target_semaphore(%94 : memref<!tpu.dma_semaphore, #tpu.memory_space<semaphore_mem>>)
      }
      %c16_i32_40 = arith.constant 16 : i32
    } else {
    }
    %c0 = arith.constant 0 : index
    %c0_8 = arith.constant 0 : index
    %17 = vector.load %arg3[%c0, %c0_8] : memref<16x1xi32, #tpu.memory_space<vmem>>, vector<16x1xi32>
    %c0_9 = arith.constant 0 : index
    %c0_10 = arith.constant 0 : index
    %18 = vector.load %arg5[%c0_9, %c0_10] : memref<3x128xf32, #tpu.memory_space<vmem>>, vector<3x128xf32>
    %c0_11 = arith.constant 0 : index
    %c0_12 = arith.constant 0 : index
    %19 = vector.load %arg4[%c0_11, %c0_12] : memref<16x128xf32, #tpu.memory_space<vmem>>, vector<16x128xf32>
    %c0_i32_13 = arith.constant 0 : i32
    %20 = vector.broadcast %c0_i32_13 : i32 to vector<16x1xi32>
    %21 = arith.cmpi eq, %17, %20 : vector<16x1xi32>
    %22 = vector.extract_strided_slice %18 {offsets = [0, 0], sizes = [1, 128], strides = [1, 1]} : vector<3x128xf32> to vector<1x128xf32>
    %cst = arith.constant 0.000000e+00 : f32
    %23 = vector.shape_cast %21 : vector<16x1xi1> to vector<16x1xi1>
    %24 = vector.broadcast %23 : vector<16x1xi1> to vector<16x128xi1>
    %25 = vector.shape_cast %22 : vector<1x128xf32> to vector<1x128xf32>
    %26 = vector.broadcast %25 : vector<1x128xf32> to vector<16x128xf32>
    %27 = vector.broadcast %cst : f32 to vector<16x128xf32>
    %28 = arith.select %24, %26, %27 : vector<16x128xi1>, vector<16x128xf32>
    %29 = arith.addf %19, %28 : vector<16x128xf32>
    %c1_i32_14 = arith.constant 1 : i32
    %30 = vector.broadcast %c1_i32_14 : i32 to vector<16x1xi32>
    %31 = arith.cmpi eq, %17, %30 : vector<16x1xi32>
    %32 = vector.extract_strided_slice %18 {offsets = [1, 0], sizes = [1, 128], strides = [1, 1]} : vector<3x128xf32> to vector<1x128xf32>
    %cst_15 = arith.constant 0.000000e+00 : f32
    %33 = vector.shape_cast %31 : vector<16x1xi1> to vector<16x1xi1>
    %34 = vector.broadcast %33 : vector<16x1xi1> to vector<16x128xi1>
    %35 = vector.shape_cast %32 : vector<1x128xf32> to vector<1x128xf32>
    %36 = vector.broadcast %35 : vector<1x128xf32> to vector<16x128xf32>
    %37 = vector.broadcast %cst_15 : f32 to vector<16x128xf32>
    %38 = arith.select %34, %36, %37 : vector<16x128xi1>, vector<16x128xf32>
    %39 = arith.addf %29, %38 : vector<16x128xf32>
    %c2_i32_16 = arith.constant 2 : i32
    %40 = vector.broadcast %c2_i32_16 : i32 to vector<16x1xi32>
    %41 = arith.cmpi eq, %17, %40 : vector<16x1xi32>
    %42 = vector.extract_strided_slice %18 {offsets = [2, 0], sizes = [1, 128], strides = [1, 1]} : vector<3x128xf32> to vector<1x128xf32>
    %cst_17 = arith.constant 0.000000e+00 : f32
    %43 = vector.shape_cast %41 : vector<16x1xi1> to vector<16x1xi1>
    %44 = vector.broadcast %43 : vector<16x1xi1> to vector<16x128xi1>
    %45 = vector.shape_cast %42 : vector<1x128xf32> to vector<1x128xf32>
    %46 = vector.broadcast %45 : vector<1x128xf32> to vector<16x128xf32>
    %47 = vector.broadcast %cst_17 : f32 to vector<16x128xf32>
    %48 = arith.select %44, %46, %47 : vector<16x128xi1>, vector<16x128xf32>
    %49 = arith.addf %39, %48 : vector<16x128xf32>
    %c0_18 = arith.constant 0 : index
    %c0_19 = arith.constant 0 : index
    %50 = vector.load %arg6[%c0_18, %c0_19] : memref<1x128xf32, #tpu.memory_space<vmem>>, vector<1x128xf32>
    %c0_20 = arith.constant 0 : index
    %c0_21 = arith.constant 0 : index
    %51 = vector.load %arg7[%c0_20, %c0_21] : memref<1x128xf32, #tpu.memory_space<vmem>>, vector<1x128xf32>
    %c0_i32_22 = arith.constant 0 : i32
    %c16_i32 = arith.constant 16 : i32
    %52 = arith.addi %c0_i32_22, %c16_i32 : i32
    %c1_i32_23 = arith.constant 1 : i32
    scf.for %arg12 = %c0_i32_22 to %52 step %c1_i32_23  : i32 {
      %c1_i32_34 = arith.constant 1 : i32
      %79 = arith.muli %arg12, %c1_i32_34 : i32
      %c0_i32_35 = arith.constant 0 : i32
      %80 = arith.addi %c0_i32_35, %79 : i32
      %c0_i32_36 = arith.constant 0 : i32
      %c0_i32_37 = arith.constant 0 : i32
      %81 = tpu.memref_slice %arg8[%c0_i32_36, %c0_i32_37] : memref<64x128xf32, #tpu.memory_space<any>> -> memref<1x128xf32, #tpu.memory_space<any>>
      %c0_i32_38 = arith.constant 0 : i32
      %82 = tpu.memref_slice %arg10[%9, %80, %c0_i32_38] : memref<2x16x128xf32, #tpu.memory_space<vmem>> -> memref<1x1x128xf32, #tpu.memory_space<vmem>>
      %83 = tpu.memref_squeeze %82 : memref<1x1x128xf32, #tpu.memory_space<vmem>> -> memref<1x128xf32, #tpu.memory_space<vmem>>
      %84 = tpu.memref_slice %arg11[%9] : memref<2x!tpu.dma_semaphore, #tpu.memory_space<semaphore_mem>> -> memref<1x!tpu.dma_semaphore, #tpu.memory_space<semaphore_mem>>
      %85 = tpu.memref_squeeze %84 : memref<1x!tpu.dma_semaphore, #tpu.memory_space<semaphore_mem>> -> memref<!tpu.dma_semaphore, #tpu.memory_space<semaphore_mem>>
      tpu.wait_dma2 semaphore(%85 : memref<!tpu.dma_semaphore, #tpu.memory_space<semaphore_mem>>) src(%81 : memref<1x128xf32, #tpu.memory_space<any>>) dst(%83 : memref<1x128xf32, #tpu.memory_space<vmem>>)
    }
    %c16_i32_24 = arith.constant 16 : i32
    %53 = arith.index_cast %9 : i32 to index
    %c0_25 = arith.constant 0 : index
    %c0_26 = arith.constant 0 : index
    %54 = vector.load %arg10[%53, %c0_25, %c0_26] : memref<2x16x128xf32, #tpu.memory_space<vmem>>, vector<1x16x128xf32>
    %55 = vector.shape_cast %54 : vector<1x16x128xf32> to vector<16x128xf32>
    %56 = arith.addf %55, %49 : vector<16x128xf32>
    %cst_27 = arith.constant dense<0.000000e+00> : vector<16xf32>
    %57 = vector.multi_reduction <add>, %56, %cst_27 [1] : vector<16x128xf32> to vector<16xf32>
    %58 = vector.shape_cast %57 : vector<16xf32> to vector<16x1xf32>
    %cst_28 = arith.constant 1.280000e+02 : f32
    %59 = vector.broadcast %cst_28 : f32 to vector<16x1xf32>
    %60 = arith.divf %58, %59 : vector<16x1xf32>
    %61 = vector.broadcast %60 : vector<16x1xf32> to vector<16x128xf32>
    %62 = arith.subf %56, %61 : vector<16x128xf32>
    %63 = arith.mulf %62, %62 : vector<16x128xf32>
    %cst_29 = arith.constant dense<0.000000e+00> : vector<16xf32>
    %64 = vector.multi_reduction <add>, %63, %cst_29 [1] : vector<16x128xf32> to vector<16xf32>
    %65 = vector.shape_cast %64 : vector<16xf32> to vector<16x1xf32>
    %cst_30 = arith.constant 1.270000e+02 : f32
    %66 = vector.broadcast %cst_30 : f32 to vector<16x1xf32>
    %67 = arith.divf %65, %66 : vector<16x1xf32>
    %68 = math.sqrt %67 : vector<16x1xf32>
    %cst_31 = arith.constant 9.99999997E-7 : f32
    %69 = vector.broadcast %cst_31 : f32 to vector<16x1xf32>
    %70 = arith.addf %68, %69 : vector<16x1xf32>
    %71 = tpu.reciprocal %70 : vector<16x1xf32> -> vector<16x1xf32>
    %72 = vector.broadcast %50 : vector<1x128xf32> to vector<16x128xf32>
    %73 = vector.broadcast %71 : vector<16x1xf32> to vector<16x128xf32>
    %74 = arith.mulf %72, %73 : vector<16x128xf32>
    %75 = arith.mulf %62, %74 : vector<16x128xf32>
    %76 = vector.broadcast %51 : vector<1x128xf32> to vector<16x128xf32>
    %77 = arith.addf %75, %76 : vector<16x128xf32>
    %c0_32 = arith.constant 0 : index
    %c0_33 = arith.constant 0 : index
    %78 = vector.load %arg9[%c0_32, %c0_33] : memref<16x128xf32, #tpu.memory_space<vmem>>, vector<16x128xf32>
    tpu.vector_store %arg9[%c0_32, %c0_33], %77 {strides = array<i32>} : memref<16x128xf32, #tpu.memory_space<vmem>>, vector<16x128xf32>,
    return
  }
  func.func @transform_0(%arg0: i32, %arg1: i32, %arg2: memref<64xi32, #tpu.memory_space<smem>>) -> (i32, i32) {
    %c2_i32 = arith.constant 2 : i32
    %0 = arith.muli %arg0, %c2_i32 : i32
    %1 = arith.addi %0, %arg1 : i32
    %c0_i32 = arith.constant 0 : i32
    %c0_i32_0 = arith.constant 0 : i32
    return %1, %c0_i32 : i32, i32
  }
  func.func @transform_1(%arg0: i32, %arg1: i32, %arg2: memref<64xi32, #tpu.memory_space<smem>>) -> (i32, i32) {
    %c0_i32 = arith.constant 0 : i32
    %c0_i32_0 = arith.constant 0 : i32
    return %arg1, %c0_i32 : i32, i32
  }
  func.func @transform_2(%arg0: i32, %arg1: i32, %arg2: memref<64xi32, #tpu.memory_space<smem>>) -> (i32, i32) {
    %c0_i32 = arith.constant 0 : i32
    %c0_i32_0 = arith.constant 0 : i32
    %c0_i32_1 = arith.constant 0 : i32
    return %c0_i32, %c0_i32_0 : i32, i32
  }
  func.func @transform_3(%arg0: i32, %arg1: i32, %arg2: memref<64xi32, #tpu.memory_space<smem>>) -> (i32, i32) {
    %c0_i32 = arith.constant 0 : i32
    %c0_i32_0 = arith.constant 0 : i32
    %c0_i32_1 = arith.constant 0 : i32
    return %c0_i32, %c0_i32_0 : i32, i32
  }
  func.func @transform_4(%arg0: i32, %arg1: i32, %arg2: memref<64xi32, #tpu.memory_space<smem>>) -> (i32, i32) {
    %c0_i32 = arith.constant 0 : i32
    %c0_i32_0 = arith.constant 0 : i32
    %c0_i32_1 = arith.constant 0 : i32
    return %c0_i32, %c0_i32_0 : i32, i32
  }
  func.func @transform_6(%arg0: i32, %arg1: i32, %arg2: memref<64xi32, #tpu.memory_space<smem>>) -> (i32, i32) {
    %c2_i32 = arith.constant 2 : i32
    %0 = arith.muli %arg0, %c2_i32 : i32
    %1 = arith.addi %0, %arg1 : i32
    %c0_i32 = arith.constant 0 : i32
    %c0_i32_0 = arith.constant 0 : i32
    return %1, %c0_i32 : i32, i32
  }
}

</mosaic_0001>

<bundles_post_ra>
// kernel: tpu_custom_call.1
= control target key start
LH: loop header
LB: loop body
LE: loop exit
PB: predicated region body
PF: predicated region fallthrough
CT: control target
= control target key end

     0   :  { %s1216_s27 = smov [#allocation5]   ;;  %s1537_s0 = inlined_call_operand.vmem [shape: s32[64], index: 0, kind: input, shape index: {}]   ;;  %s1538_s1 = inlined_call_operand.vmem [shape: s32[64,1], index: 1, kind: input, shape index: {}]   ;;  %s1539_s2 = inlined_call_operand.hbm [shape: f32[32,128], index: 2, kind: input, shape index: {}]   ;;  %s1540_s3 = inlined_call_operand.vmem [shape: f32[3,128], index: 3, kind: input, shape index: {}]   ;;  %s1541_s4 = inlined_call_operand.vmem [shape: f32[1,128], index: 4, kind: input, shape index: {}]   ;;  %s1542_s5 = inlined_call_operand.hbm [shape: f32[1,128], index: 5, kind: input, shape index: {}]   ;;  %s1543_s6 = inlined_call_operand.vmem [shape: f32[64,128], index: 6, kind: input, shape index: {}]   ;;  %s1544_s7 = inlined_call_operand.hbm [shape: f32[64,128], index: 7, kind: output, shape index: {}]  }
   0x1   :  { %1556 = sst [smem:[#allocation26_spill]] %s1538_s1  ;;  %s13_s26 = sshll.u32 %s1537_s0, 4  ;;  %s14_s26 = int_to_ptr.vmem [resolvable:$true] %s13_s26 }
   0x2   :  { %1557 = sst [smem:[#allocation27_spill]] %s1539_s2 }
   0x3   :  { %1558 = sst [smem:[#allocation28_spill]] %s1540_s3 }
   0x4   :  { %1559 = sst [smem:[#allocation29_spill]] %s1541_s4 }
   0x5   :  { %1560 = sst [smem:[#allocation30_spill]] %s1542_s5 }
   0x6   :  { %1561 = sst [smem:[#allocation31_spill]] %s1543_s6 }
   0x7   :  { %1562 = sst [smem:[#allocation32_spill]] %s1544_s7 }
   0x8   :  { %16 = dma.vmem_to_smem %s14_s26, 16, %s1216_s27, [#allocation4] }
   0x9   :  { %1144 = dma.done.wait [#allocation4], 16 }
   0xa   :  { %1145 = vsyncadd [#allocation4], 4294967280 }
   0xb   :  { %19 = sfence }
   0xc   :  { %20 = vsyncpa [#allocation7], 0 }
   0xd   :  { %22 = vsyncpa [#allocation7 + $0x1], 0 }
   0xe   :  { %23 = vsyncpa [#allocation10], 0 }
   0xf   :  { %24 = vsyncpa [#allocation8], 0 }
  0x10   :  { %26 = vsyncpa [#allocation8 + $0x1], 0  ;;  %s1268_s28 = smov 0   ;;  %s1270_s29 = smov 0  }
  0x11   :  { %s1272_s30 = smov 0   ;;  %s1274_s8 = smov 0  }
  0x12   :  { %s1276_s0 = smov 0   ;;  %s1278_s9 = smov 0  }
  0x13   :  { %s1280_s10 = smov 0   ;;  %s1282_s11 = smov 0  }
  0x14   :  { %s1284_s12 = smov 0   ;;  %s1286_s13 = smov 0  }
  0x15   :  { %s1288_s14 = smov 0  }
  0x16 LB: > { %1563 = sst [smem:[#allocation19_spill]] %s1162_s28  ;;  %s787_s15 = sadd.s32 4294967295, %s1202_s14   ;;  %s1202_s14 = sphi %s1288_s14, %s32_s14   ;;  %s1198_s13 = sphi %s1286_s13, %s1606_s13   ;;  %s1194_s12 = sphi %s1284_s12, %s1605_s12   ;;  %s1190_s11 = sphi %s1282_s11, %s1598_s11   ;;  %s1186_s10 = sphi %s1280_s10, %s1597_s10   ;;  %s1182_s9 = sphi %s1278_s9, %s1604_s9   ;;  %s1178_s0 = sphi %s1276_s0, %s1603_s0   ;;  %s1174_s8 = sphi %s1274_s8, %s1602_s8   ;;  %s1170_s30 = sphi %s1272_s30, %s1601_s30   ;;  %s1166_s29 = sphi %s1270_s29, %s1600_s29   ;;  %s1162_s28 = sphi %s1268_s28, %s1599_s28  }
  0x17   : > { %1564 = sst [smem:[#allocation20_spill]] %s1186_s10  ;;  %s788_s16 = sadd.s32 4294967294, %s1202_s14  }
  0x18   : > { %1565 = sst [smem:[#allocation21_spill]] %s1194_s12  ;;  %p88_p0 = scmp.ne.s32.totalorder %s1182_s9, %s1178_s0 }
  0x19   : > { %1566 = sst [smem:[#allocation22_spill]] %s1198_s13  ;;  %p89_p1 = scmp.eq.s32.totalorder %s1202_s14, 0 }
  0x1a   : > { %1567 = sst [smem:[#allocation23_spill]] %s1202_s14  ;;  %p94_p2 = scmp.ne.s32.totalorder %s1178_s0, %s1174_s8 }
  0x1b   : > { %p1328_p3 = scmp.eq.s32.totalorder %s787_s15, 0  ;;  %p1333_p4 = por %p89_p1, %p88_p0 }
  0x1c   : > { %p184_p5 = scmp.ne.s32.totalorder %s1170_s30, %s1166_s29  ;;  %p185_p7 = scmp.eq.s32.totalorder %s787_s15, 3 }
  0x1d   : > { %p1341_p6 = por %p1328_p3, %p94_p2  ;;  %p190_p8 = scmp.ne.s32.totalorder %s1166_s29, %s1162_s28 }
  0x1e   : > { %p191_p9 = scmp.eq.s32.totalorder %s788_s16, 3  ;;  %p1347_p10 = por %p185_p7, %p184_p5 }
  0x1f   : > { %p793_p11 = scmp.ge.s32.totalorder %s1202_s14, 1  ;;  %p198_p13 = scmp.lt.s32.totalorder %s1202_s14, 5 }
  0x20   : > { %s1571_s22 = scalar_select %p1347_p10, 1, 0 }
  0x21   : > { %p1352_p12 = por %p191_p9, %p190_p8  ;;  %s1575_s5 = sld [smem:[#allocation30_spill]] }
  0x22   : > { %1572 = sst [smem:[#allocation24_spill]] %s1571_s22  ;;  %p1360_p0 = pnand %p793_p11, %p198_p13 }
  0x23   : > { %s1573_s23 = scalar_select %p1352_p12, 1, 0 }
  0x24   : > { %p836_p1 = pneg %p1360_p0  ;;  %s1217_s8 = smov [#allocation9]  }
  0x25   : > { %1574 = sst [smem:[#allocation25_spill]] %s1573_s23  ;;  %s218_s15 = sshll.u32 %s1217_s8, 4  ;;  %s219_s15 = int_to_ptr.vmem [resolvable:$true] %s218_s15 }
  0x26   : > { %p849_p2 = scmp.lt.s32.totalorder %s1202_s14, 4  ;;  %p837_p5 = pnand %p836_p1, %p1328_p3 }
  0x27   : > { %s216_s26 = sshll.u32 %s1575_s5, 4  ;;  %s41_s24 = sadd.s32 1, %s1194_s12  ;;  %s217_s26 = int_to_ptr.hbm [resolvable:$true] %s216_s26 }
  0x28   : > { %p1371_p7 = pnand %p849_p2, %p1333_p4  ;;  %s44_s25 = sadd.s32 1, %s1198_s13 }
  0x29   : > { %839 = dma.hbm_to_vmem [thread:$0]  (!%p837_p5), %s217_s26, 16, %s219_s15, [#allocation10]  }
  0x2a   : > { %p42_p8 = scmp.ge.s32.totalorder %s41_s24, 2  ;;  %s791_s19 = sshll.u32 %s1198_s13, 1 }
  0x2b   : > { %s168_s17 = sadd.s32 %s1194_s12, %s791_s19  ;;  %s242_s5 = sand.u32 1, %s1182_s9  }
  0x2c   : > { %s1608_s24 = smov (%p42_p8, %s41_s24), 0  ;;  %s1610_s25 = smov (!%p42_p8, %s44_s25), %s1198_s13 }
  0x2d   : > { %s78_s8 = ssub.s32 %s1194_s12, %s1608_s24  ;;  %p46_p4 = scmp.ge.s32.totalorder %s1610_s25, 2 }
  0x2e   : > { %p79_p9 = scmp.eq.s32.totalorder %s78_s8, 0  ;;  %s796_s20 = sshll.u32 %s242_s5, 4 }
  0x2f   : > { %s824_s23 = sshll.u32 %s1194_s12, 4  ;;  %s1612_s25 = smov (%p46_p4, %s1610_s25), 0 }
  0x30   : > { %s1578_s26 = sadd.s32 1, %s1182_s9  ;;  %s792_s19 = sshll.u32 %s1612_s25, 1 }
  0x31   : > { %s1391_s15 = scalar_select %p79_p9, %s1182_s9, %s1578_s26  }
  0x32   : > { %s170_s28 = sadd.s32 %s792_s19, %s1608_s24  ;;  %s1579_s2 = sld [smem:[#allocation27_spill]] }
  0x33   : > { %s171_s7 = ssub.s32 %s168_s17, %s170_s28  ;;  %s246_s8 = scalar_lea.vmem [#allocation6], %s796_s20 }
  0x34   : > { %p172_p11 = scmp.eq.s32.totalorder %s171_s7, 0  ;;  %s254_s4 = sshll.u32 %s246_s8, 4  ;;  %s255_s4 = int_to_ptr.vmem [resolvable:$true] %s254_s4 }
  0x35   : > { %s1580_s12 = sadd.s32 1, %s1170_s30  ;;  %s243_s1 = scalar_lea.sflag [#allocation7], %s242_s5 }
  0x36   : > { %s1401_s6 = scalar_select %p172_p11, %s1170_s30, %s1580_s12  }
  0x37   : > { %s1218_s10 = smov 128   ;;  %s1219_s26 = smov 8  }
  0x38   : > { %s251_s13 = scalar_lea.hbm %s1579_s2, %s824_s23  ;;  %266 = sbr.rel (%p1360_p0) target bundleno = 576 (0x240), region = 40 }
  0x39   : > { %s252_s3 = sshll.u32 %s251_s13, 4  ;;  %s268_s28 = sand.u32 (!%p1360_p0), 1, %s1178_s0   ;;  %s253_s3 = int_to_ptr.hbm [resolvable:$true] %s252_s3 }
  0x3a   : > { %843 = dma.hbm_to_vmem [thread:$0]  (!%p1371_p7), %s253_s3, 256, %s255_s4, %s243_s1, %s1218_s10, %s1218_s10, %s1219_s26  }
  0x3b   : > { %s1408_s13 = sshll.u32 (!%p1360_p0), %s268_s28, 4  ;;  %s269_s7 = scalar_lea.sflag (!%p1360_p0), [#allocation7], %s268_s28 }
  0x3d   : > { %1147 = dma.done.wait (%p1341_p6), %s269_s7, 256  }
  0x3e   : > { %1149 = vsyncadd (%p1341_p6), %s269_s7, 4294967040 }
  0x3f   : > { %1151 = dma.done.wait (%p1328_p3), [#allocation10], 16  }
  0x40   : > { %1153 = vsyncadd (%p1328_p3), [#allocation10], 4294967280  ;;  %s1581_s1 = sld [smem:[#allocation20_spill]]  ;;  %s1555_s3 = sand.u32 1, %s1166_s29  }
  0x41   : > { %s803_s4 = sshll.u32 %s1190_s11, 1  ;;  %s802_s5 = sshll.u32 %s1555_s3, 4 }
  0x42   : > { %s1582_s16 = sld [smem:[#allocation26_spill]]  ;;  %s1437_s26 = scalar_lea.vmem [#allocation11], %s802_s5 }
  0x46   : > { %s1424_s10 = sadd.s32 %s1581_s1, %s803_s4  ;;  %p326_p13 = scmp.lt.s32.totalorder %s1581_s1, 0 }
  0x47   : > { %s804_s12 = sshll.u32 %s1424_s10, 1  ;;  %s327_s17 = ssub.s32 0, %s1581_s1 }
  0x48   : > { %p315_p6 = scmp.lt.s32.totalorder %s804_s12, 7  ;;  %s806_s18 = smin.u32 %s1581_s1, %s327_s17 }
  0x49   : > { %s329_s22 = sand.u32 1, %s806_s18   ;;  %p809_p0 = scmp.ne.s32.totalorder %s1581_s1, 0 }
  0x4a   : > { %s1614_s12 = smov (!%p315_p6, %s804_s12), 7  ;;  %s330_s19 = ssub.s32 0, %s329_s22 }
  0x4b   : > { %s805_s21 = sshll.u32 %s1614_s12, 3  ;;  %s1616_s19 = smov (!%p326_p13, %s330_s19), %s329_s22 }
  0x4c   : > { %s1433_s20 = scalar_lea.vmem %s1582_s16, %s805_s21  ;;  %p808_p3 = scmp.lt.s32.totalorder %s1616_s19, 0 }
  0x4d   : > { %s336_s8 = sadd.s32 2, %s1616_s19  ;;  %341 = sbr.rel (%p809_p0) target bundleno = 100 (0x64), region = 52 }
  0x4e   : > { %s1618_s8 = smov (!%p808_p3, %s336_s8), %s1616_s19  ;;  %s810_s28 = sshll.u32 (!%p809_p0), %s1190_s11, 5 }
  0x4f   : > { %s1204_s7 = smov (!%p809_p0), 0  }
  0x52 LB: >> { %s349_s4 = sadd.s32 %s1206_s7, %s810_s28  ;;  %s1583_s21 = sld [smem:[#allocation31_spill]]  ;;  %s1206_s7 = sphi %s1204_s7, %s348_s7  }
  0x53   : >> { %s350_s12 = sld [smem:[#allocation5 + %s349_s4]]  ;;  %s352_s23 = scalar_lea.vmem [#allocation2], %s1206_s7 }
  0x59   : >> { %s351_s22 = scalar_lea.vmem %s1583_s21, %s350_s12 }
  0x5a   : >> { %v367_v0 = vld [vmem:[%s351_s22] sm:$0x1] }
  0x5b   : >> { %368 = vst [vmem:[%s352_s23] sm:$0x1] %v367_v0 }
  0x5c   : >> { %386 = vsyncadd [#allocation3], 16  ;;  %s348_s7 = sadd.s32 1, %s1206_s7  }
  0x5d   : >> { %p345_p1 = scmp.ge.s32.totalorder %s348_s7, 16  }
  0x5f   : > { %347 = sbr.rel (!%p345_p1) target bundleno = 82 (0x52), region = 197 }
  0x64 PF: > { %s1584_s1 = sld [smem:[#allocation20_spill]] }
  0x6a   : > { %s387_s5 = sadd.s32 1, %s1584_s1 }
  0x6b   : > { %p811_p2 = scmp.ge.s32.totalorder %s387_s5, 2 }
  0x6c   : > { %s1585_s27 = sld [smem:[#allocation20_spill]] (!%p811_p2)  ;;  %s392_s16 = ssub.s32 (!%p811_p2), 1, %s1618_s8 }
  0x6d   : > { %391 = sbr.rel (%p811_p2) target bundleno = 136 (0x88), region = 93  ;;  %s812_s19 = sshll.u32 (!%p811_p2), %s1190_s11, 5 }
  0x6e   : > { %s1208_s18 = smov (!%p811_p2), 0  }
  0x72   : > { %s825_s4 = sshll.u32 %s1585_s27, 4 }
  0x73   : > { %s826_s12 = sadd.s32 16, %s825_s4 }
  0x74   : > { %s395_s17 = sadd.s32 %s826_s12, %s812_s19 }
  0x75 LB: >> { %s402_s21 = sadd.s32 %s1210_s18, %s395_s17  ;;  %s814_s7 = sshll.u32 %s392_s16, 4  ;;  %s1210_s18 = sphi %s1208_s18, %s401_s18  }
  0x76   : >> { %s403_s22 = sld [smem:[#allocation5 + %s402_s21]]  ;;  %s406_s28 = sadd.s32 %s1210_s18, %s814_s7 }
  0x77   : >> { %s1586_s5 = sld [smem:[#allocation31_spill]]  ;;  %s407_s14 = scalar_lea.vmem [#allocation2], %s406_s28 }
  0x78   : >> { %s408_s2 = scalar_lea.sflag [#allocation3], %s392_s16 }
  0x7d   : >> { %s404_s3 = scalar_lea.vmem %s1586_s5, %s403_s22 }
  0x7e   : >> { %v423_v1 = vld [vmem:[%s404_s3] sm:$0x1] }
  0x7f   : >> { %424 = vst [vmem:[%s407_s14] sm:$0x1] %v423_v1 }
  0x80   : >> { %442 = vsyncadd %s408_s2, 16  ;;  %s401_s18 = sadd.s32 1, %s1210_s18  }
  0x81   : >> { %p398_p5 = scmp.ge.s32.totalorder %s401_s18, 16  }
  0x83   : > { %400 = sbr.rel (!%p398_p5) target bundleno = 117 (0x75), region = 208 }
  0x88 PF: > { %v443_v2 = vld [vmem:[%s1433_s20] sm:$0xff]  ;;  %v1220_v3 = vmov 0   ;;  %v444_v6 = vld [vmem:[%s1433_s20 + $0x8] sm:$0xff]  ;;  %s1587_s14 = sld [smem:[#allocation29_spill]]  ;;  %s1589_s16 = scalar_lea.vmem [#allocation6], %s1408_s13 }
  0x89   : > { %974 = vset.pattern.permute.xlu1 %v1220_v3  ;;  %973 = vset.pattern.permute.xlu0 %v1220_v3  ;;  %vm465_vm0 = vcmp.eq.s32.totalorder %v443_v2, 1  ;;  %vm448_vm1 = vcmp.eq.s32.totalorder %v443_v2, 0  ;;  %vm482_vm2 = vcmp.eq.s32.totalorder %v443_v2, 2  ;;  %vm466_vm3 = vcmp.eq.s32.totalorder %v444_v6, 1  ;;  %v1458_v12 = vld [vmem:[#allocation9] sm:$0x1]  ;;  %s1590_s19 = smov %s1589_s16 }
  0x8a   : > { %v467_v4 = vsel %vm465_vm0, 1, %v1220_v3  ;;  %v450_v5 = vsel %vm448_vm1, 1, %v1220_v3  ;;  %975 = vset.pattern.permute.xlu2 %v1220_v3  ;;  %v484_v7 = vsel %vm482_vm2, 1, %v1220_v3  ;;  %vm449_vm4 = vcmp.eq.s32.totalorder %v444_v6, 0  ;;  %s1588_s27 = sld [smem:[#allocation28_spill]]  ;;  %v446_v19 = vld [vmem:[%s1589_s16] sm:$0xff] }
  0x8b   : > { %470 = vperm.xlu1 %974, %v467_v4   ;;  %453 = vperm.xlu0 %973, %v450_v5   ;;  %vm483_vm5 = vcmp.eq.s32.totalorder %v444_v6, 2  ;;  %v468_v8 = vsel %vm466_vm3, 1, %v1220_v3  ;;  %v451_v9 = vsel %vm449_vm4, 1, %v1220_v3  ;;  %v447_v29 = vld [vmem:[%s1590_s19 + $0x8] sm:$0xff]  ;;  %s1212_s4 = smov 0  }
  0x8c   : > { %487 = vperm.xlu2 %975, %v484_v7   ;;  %v485_v10 = vsel %vm483_vm5, 1, %v1220_v3 }
  0x8e   : > { %v1456_v11 = vld [vmem:[%s1587_s14] sm:$0x1] }
  0x90   : > { %v445_v13 = vld [vmem:[%s1588_s27] sm:$0x7] }
  0x91   : > { %v477_v15 = vperm.slane %v445_v13, 1  ;;  %v460_v16 = vperm.slane %v445_v13, 0  ;;  %v494_v17 = vperm.slane %v445_v13, 2 }
  0x93   : > { %473 = vperm.xlu1 %974, %v468_v8   ;;  %456 = vperm.xlu0 %973, %v451_v9  }
  0x94   : > { %490 = vperm.xlu2 %975, %v485_v10  }
  0xe6   : > { %v488_v14 = vpop.permute.xlu2 %487 }
  0xe7   : > { %vm492_vm6 = vcmp.eq.s32.totalorder %v488_v14, 1 }
  0xe8   : > { %v495_v24 = vsel %vm492_vm6, %v494_v17, 0.0 }
  0xee   : > { %v491_v27 = vpop.permute.xlu2 %490 }
  0xef   : > { %vm493_vm11 = vcmp.eq.s32.totalorder %v491_v27, 1 }
  0xf0   : > { %v496_v35 = vsel %vm493_vm11, %v494_v17, 0.0 }
  0xfd   : > { %v471_v18 = vpop.permute.xlu1 %470  ;;  %v454_v20 = vpop.permute.xlu0 %453 }
  0xfe   : > { %vm475_vm7 = vcmp.eq.s32.totalorder %v471_v18, 1  ;;  %vm458_vm8 = vcmp.eq.s32.totalorder %v454_v20, 1 }
  0xff   : > { %v478_v21 = vsel %vm475_vm7, %v477_v15, 0.0  ;;  %v461_v22 = vsel %vm458_vm8, %v460_v16, 0.0 }
 0x100   : > { %v463_v23 = vadd.f32 %v461_v22, %v446_v19 }
 0x102   : > { %v480_v25 = vadd.f32 %v478_v21, %v463_v23 }
 0x104   : > { %v497_v26 = vadd.f32 %v495_v24, %v480_v25 }
 0x105   : > { %v474_v28 = vpop.permute.xlu1 %473  ;;  %v457_v30 = vpop.permute.xlu0 %456 }
 0x106   : > { %vm476_vm9 = vcmp.eq.s32.totalorder %v474_v28, 1  ;;  %vm459_vm10 = vcmp.eq.s32.totalorder %v457_v30, 1 }
 0x107   : > { %v462_v31 = vsel %vm459_vm10, %v460_v16, 0.0  ;;  %v479_v33 = vsel %vm476_vm9, %v477_v15, 0.0 }
 0x108   : > { %v464_v32 = vadd.f32 %v462_v31, %v447_v29 }
 0x10a   : > { %v481_v34 = vadd.f32 %v479_v33, %v464_v32 }
 0x10c   : > { %v498_v36 = vadd.f32 %v496_v35, %v481_v34 }
 0x10d LB: >> { %s507_s12 = scalar_lea.sflag [#allocation3], %s1618_s8  ;;  %s1214_s4 = sphi %s1212_s4, %s506_s4  }
 0x10e   : >> { %1154 = dma.done.wait %s507_s12, 16 }
 0x10f   : >> { %1155 = vsyncadd %s507_s12, 4294967280  ;;  %s506_s4 = sadd.s32 1, %s1214_s4  }
 0x110   : >> { %p503_p7 = scmp.ge.s32.totalorder %s506_s4, 16  }
 0x111   : > { %s815_s13 = sshll.u32 (%p503_p7), %s1618_s8, 4  ;;  %v1221_v41 = vmov (%p503_p7), 128.0   ;;  %v1222_v56 = vmov (%p503_p7), 127.0   ;;  %v602_v34 = vperm.slane (%p503_p7), %v1456_v11, 0  ;;  %s827_s8 = sshll.u32 (%p503_p7), %s1424_s10, 4 }
 0x112   : > { %505 = sbr.rel (!%p503_p7) target bundleno = 269 (0x10d), region = 219  ;;  %s512_s17 = scalar_lea.vmem (%p503_p7), [#allocation2], %s815_s13  ;;  %976 = vrcp.f32 (%p503_p7), %v1221_v41 }
 0x113   : > { %v513_v37 = vld [vmem:[%s512_s17] sm:$0xff] (%p503_p7)  ;;  %v514_v39 = vld [vmem:[%s512_s17 + $0x8] sm:$0xff] (%p503_p7)  ;;  %978 = vrcp.f32 (%p503_p7), %v1222_v56  ;;  %s1591_s7 = sld [smem:[#allocation32_spill]] (%p503_p7)  ;;  %s630_s23 = sshll.u32 (%p503_p7), %s1437_s26, 4  ;;  %s631_s23 = int_to_ptr.vmem [resolvable:$true] %s630_s23 }
 0x114   : > { %v515_v38 = vadd.f32 (%p503_p7), %v513_v37, %v497_v26  ;;  %v516_v40 = vadd.f32 (%p503_p7), %v514_v39, %v498_v36  ;;  %s1593_s10 = sand.u32 (%p503_p7), 1, %s1166_s29  }
 0x115   : > { %s616_s5 = scalar_lea.sflag (%p503_p7), [#allocation8], %s1593_s10 }
 0x116   : > { %517 = vadd.xlane.f32.xlu0 (%p503_p7), %v515_v38 }
 0x118   : > { %v977_v42 = vpop.eup %976 }
 0x119   : > { %v522_v43 = vmul.f32 128.0, %v977_v42  ;;  %vm526_vm12 = vweird.f32 %v977_v42  ;;  %v979_v57 = vpop.eup %978  ;;  %s629_s22 = scalar_lea.hbm %s1591_s7, %s827_s8  ;;  %s1080_s20 = scalar_lea.hbm %s1591_s7, 64 }
 0x11a   : > { %v539_v58 = vmul.f32 127.0, %v979_v57  ;;  %vm543_vm13 = vweird.f32 %v979_v57  ;;  %s632_s1 = sshll.u32 %s629_s22, 4  ;;  %s633_s1 = int_to_ptr.hbm [resolvable:$true] %s632_s1 }
 0x11b   : > { %v523_v44 = vsub.f32 1.0, %v522_v43  ;;  %s1074_s2 = sshra.s32 %s633_s1, 4  ;;  %s1075_s2 = int_to_ptr.hbm [resolvable:$true] %s1074_s2 }
 0x11c   : > { %v540_v59 = vsub.f32 1.0, %v539_v58  ;;  %s1076_s11 = scalar_lea.hbm %s1075_s2, 16  ;;  %p1081_p11 = scmp.lt.s32.totalorder %s1075_s2, %s1591_s7 }
 0x11d   : > { %v524_v45 = vmul.f32 %v977_v42, %v523_v44  ;;  %p1077_p8 = scmp.ne.s32.totalorder %s1075_s2, %s1076_s11  ;;  %p1082_p6 = scmp.lt.s32.totalorder %s1080_s20, %s1076_s11 }
 0x11e   : > { %519 = vadd.xlane.f32.xlu0 %v516_v40  ;;  %v541_v60 = vmul.f32 %v979_v57, %v540_v59 }
 0x11f   : > { %v525_v46 = vadd.f32 %v977_v42, %v524_v45  ;;  %p1078_p4 = pnand %p1077_p8, %p1347_p10  ;;  %p1083_p13 = por %p1082_p6, %p1081_p11 }
 0x120   : > { %v542_v61 = vadd.f32 %v979_v57, %v541_v60 }
 0x121   : > { %v527_v47 = vsel %vm526_vm12, %v977_v42, %v525_v46  ;;  %v609_v42 = vperm.slane %v1458_v12, 0  ;;  %p1079_p9 = pneg %p1078_p4 }
 0x122   : > { %v544_v62 = vsel %vm543_vm13, %v979_v57, %v542_v61 }
 0x123   : > { %p1084_p3 = pnand %p1083_p13, %p1079_p9 }
 0x189   : > { %v518_v48 = vpop.xlane.xlu0 %517 }
 0x18a   : > { %v528_v49 = vmul.f32 %v527_v47, %v518_v48 }
 0x18c   : > { %v1469_v50 = vsub.f32 %v515_v38, %v528_v49 }
 0x18e   : > { %v532_v51 = vmul.f32 %v1469_v50, %v1469_v50 }
 0x190   : > { %534 = vadd.xlane.f32.xlu1 %v532_v51 }
 0x191   : > { %v520_v52 = vpop.xlane.xlu0 %519 }
 0x192   : > { %v529_v53 = vmul.f32 %v527_v47, %v520_v52 }
 0x194   : > { %v1473_v54 = vsub.f32 %v516_v40, %v529_v53 }
 0x196   : > { %v533_v55 = vmul.f32 %v1473_v54, %v1473_v54 }
 0x198   : > { %536 = vadd.xlane.f32.xlu1 %v533_v55 }
 0x203   : > { %v535_v63 = vpop.xlane.xlu1 %534 }
 0x204   : > { %v545_v0 = vmul.f32 %v544_v62, %v535_v63 }
 0x206   : > { %980 = vrsqrt.f32 %v545_v0  ;;  %vm554_vm14 = vcmp.eq.f32.partialorder %v545_v0, inf  ;;  %v557_v15 = vand.u32 2147483648, %v545_v0  ;;  %vm556_vm15 = vcmp.eq.f32.partialorder %v545_v0, 0.0 }
 0x20b   : > { %v537_v1 = vpop.xlane.xlu1 %536 }
 0x20c   : > { %v981_v2 = vpop.eup %980  ;;  %v546_v3 = vmul.f32 %v544_v62, %v537_v1 }
 0x20d   : > { %v548_v4 = vmul.f32 %v981_v2, %v545_v0 }
 0x20e   : > { %982 = vrsqrt.f32 %v546_v3  ;;  %vm566_vm0 = vcmp.eq.f32.partialorder %v546_v3, inf  ;;  %v569_v23 = vand.u32 2147483648, %v546_v3  ;;  %vm568_vm1 = vcmp.eq.f32.partialorder %v546_v3, 0.0 }
 0x20f   : > { %v549_v5 = vmul.f32 %v981_v2, %v548_v4 }
 0x211   : > { %v550_v6 = vmul.f32 0.5, %v549_v5 }
 0x213   : > { %v551_v7 = vsub.f32 1.5, %v550_v6 }
 0x214   : > { %v983_v8 = vpop.eup %982 }
 0x215   : > { %v552_v9 = vmul.f32 %v981_v2, %v551_v7  ;;  %v560_v10 = vmul.f32 %v983_v8, %v546_v3 }
 0x217   : > { %v553_v13 = vmul.f32 %v552_v9, %v545_v0  ;;  %v561_v14 = vmul.f32 %v983_v8, %v560_v10 }
 0x219   : > { %v555_v16 = vsel %vm554_vm14, %v545_v0, %v553_v13  ;;  %v562_v17 = vmul.f32 0.5, %v561_v14 }
 0x21a   : > { %v558_v18 = vsel %vm556_vm15, %v557_v15, %v555_v16 }
 0x21b   : > { %v571_v19 = vadd.f32 1e-06, %v558_v18  ;;  %v563_v20 = vsub.f32 1.5, %v562_v17 }
 0x21d   : > { %984 = vrcp.f32 %v571_v19  ;;  %v564_v21 = vmul.f32 %v983_v8, %v563_v20  ;;  %v584_v30 = vand.u32 2147483648, %v571_v19  ;;  %v582_v32 = vand.u32 2147483647, %v571_v19 }
 0x21e   : > { %vm578_vm3 = vweird.f32 %v571_v19 }
 0x21f   : > { %v565_v22 = vmul.f32 %v564_v21, %v546_v3  ;;  %v585_v36 = vor.u32 1.1754944e-38, %v584_v30  ;;  %vm583_vm5 = vcmp.eq.f32.partialorder %v582_v32, 8.507059e+37 }
 0x221   : > { %v567_v24 = vsel %vm566_vm0, %v546_v3, %v565_v22 }
 0x222   : > { %v570_v25 = vsel %vm568_vm1, %v569_v23, %v567_v24 }
 0x223   : > { %v985_v26 = vpop.eup %984  ;;  %v572_v27 = vadd.f32 1e-06, %v570_v25 }
 0x224   : > { %v574_v28 = vmul.f32 %v985_v26, %v571_v19  ;;  %vm579_vm2 = vweird.f32 %v985_v26 }
 0x225   : > { %986 = vrcp.f32 %v572_v27  ;;  %vm580_vm4 = vmor %vm578_vm3, %vm579_vm2  ;;  %v598_v43 = vand.u32 2147483648, %v572_v27  ;;  %v596_v45 = vand.u32 2147483647, %v572_v27  ;;  %vm592_vm7 = vweird.f32 %v572_v27 }
 0x226   : > { %v575_v29 = vsub.f32 1.0, %v574_v28 }
 0x227   : > { %v599_v48 = vor.u32 1.1754944e-38, %v598_v43  ;;  %vm597_vm9 = vcmp.eq.f32.partialorder %v596_v45, 8.507059e+37 }
 0x228   : > { %v576_v31 = vmul.f32 %v985_v26, %v575_v29 }
 0x22a   : > { %v577_v33 = vadd.f32 %v985_v26, %v576_v31 }
 0x22b   : > { %v987_v35 = vpop.eup %986 }
 0x22c   : > { %v581_v37 = vsel %vm580_vm4, %v985_v26, %v577_v33  ;;  %v588_v38 = vmul.f32 %v987_v35, %v572_v27  ;;  %vm593_vm6 = vweird.f32 %v987_v35 }
 0x22d   : > { %v586_v39 = vsel %vm583_vm5, %v585_v36, %v581_v37  ;;  %vm594_vm8 = vmor %vm592_vm7, %vm593_vm6 }
 0x22e   : > { %v589_v40 = vsub.f32 1.0, %v588_v38  ;;  %v604_v41 = vmul.f32 %v602_v34, %v586_v39 }
 0x230   : > { %v590_v44 = vmul.f32 %v987_v35, %v589_v40  ;;  %v606_v11 = vmul.f32 %v604_v41, %v1469_v50 }
 0x232   : > { %v591_v46 = vadd.f32 %v987_v35, %v590_v44  ;;  %v611_v47 = vadd.f32 %v609_v42, %v606_v11 }
 0x234   : > { %v595_v12 = vsel %vm594_vm8, %v987_v35, %v591_v46  ;;  %613 = vst [vmem:[%s1437_s26] sm:$0xff] %v611_v47 }
 0x235   : > { %v600_v49 = vsel %vm597_vm9, %v599_v48, %v595_v12 }
 0x236   : > { %v605_v51 = vmul.f32 %v602_v34, %v600_v49 }
 0x238   : > { %v607_v50 = vmul.f32 %v605_v51, %v1473_v54 }
 0x23a   : > { %v612_v52 = vadd.f32 %v609_v42, %v607_v50 }
 0x23c   : > { %614 = vst [vmem:[%s1437_s26 + $0x8] sm:$0xff] %v612_v52 }
 0x23d   : > { %1087 = shalt.err (!%p1084_p3)
}
 0x23e   : > { %s1223_s26 = smov 128   ;;  %s1224_s19 = smov 8  }
 0x23f   : > { %834 = dma.vmem_to_hbm [thread:$0]  (%p1347_p10), %s631_s23, 256, %s633_s1, %s616_s5, %s1223_s26, %s1223_s26, %s1224_s19  }
 0x240 PF: > { %s1594_s4 = sld [smem:[#allocation23_spill]] }
 0x241   : > { %s1595_s12 = sld [smem:[#allocation19_spill]] }
 0x246   : > { %p851_p0 = scmp.ge.s32.totalorder %s1594_s4, 2 }
 0x247   : > { %s647_s17 = sand.u32 1, %s1595_s12  }
 0x248   : > { %p845_p1 = pnand %p851_p0, %p1352_p12  ;;  %s648_s8 = scalar_lea.sflag [#allocation8], %s647_s17 }
 0x24a   : > { %p846_p2 = pneg %p845_p1 }
 0x24c   : > { %1157 = dma.done.wait (%p846_p2), %s648_s8, 256  }
 0x24d   : > { %1159 = vsyncadd (%p846_p2), %s648_s8, 4294967040  ;;  %s32_s14 = sadd.s32 1, %s1594_s4   ;;  %s1597_s10 = sld [smem:[#allocation21_spill]] }
 0x24e   : > { %p29_p5 = scmp.ge.s32.totalorder %s32_s14, 6   ;;  %s1598_s11 = sld [smem:[#allocation22_spill]] }
 0x24f   : > { %s1599_s28 = smov %s1166_s29  ;;  %s1600_s29 = smov %s1170_s30 }
 0x250   : > { %s1601_s30 = smov %s1401_s6  ;;  %s1602_s8 = smov %s1178_s0 }
 0x251   : > { %s1603_s0 = smov %s1182_s9  ;;  %s1604_s9 = smov %s1391_s15 }
 0x252   : > { %s1605_s12 = smov %s1608_s24  ;;  %s1606_s13 = smov %s1612_s25 }
 0x253   :  { %31 = sbr.rel (!%p29_p5) target bundleno = 22 (0x16), region = 230 }
 0x258   :  { %654 = vsyncpa [#allocation7], 1 }
 0x259   :  { %656 = vsyncpa [#allocation7 + $0x1], 1 }
 0x25a   :  { %657 = vsyncpa [#allocation10], 1 }
 0x25b   :  { %658 = vsyncpa [#allocation8], 1 }
 0x25c   :  { %660 = vsyncpa [#allocation8 + $0x1], 1 }
 0x25d   :  { %661 = vsyncmov [#allocation3] }
 0x260   :  { %s662_s6 = vpop.sfrf %661 }
 0x261   :  { %p822_p10 = scmp.ne.s32.totalorder %s662_s6, 0 }
 0x263   :  { %666 = shalt.err (%p822_p10)  }
 0x264   :  { %668 = vsyncmov [#allocation3 + $0x1] }
 0x267   :  { %s669_s15 = vpop.sfrf %668 }
 0x268   :  { %p823_p12 = scmp.ne.s32.totalorder %s669_s15, 0 }
 0x26a   :  { %673 = shalt.err (%p823_p12)  }

</bundles_post_ra>
